<compile_context>
chip_gen: v5e
topology: v5e:2x2
jax: 0.10.0
libtpu: 0.0.40
codegen_flags: <defaults>
</compile_context>

<pallas_src>
import functools

import jax
import jax.numpy as jnp
from jax import lax
from jax.experimental import pallas as pl
from jax.experimental.pallas import tpu as pltpu


def _mha_kernel(xq_ref, xkv_ref, wq_ref, bq_ref, wkv_ref, bkv_ref,
                wp_ref, bp_ref, o_ref, k_sc, v_sc, slab,
                *, num_heads, emb_size):
    E = emb_size
    dh = E // num_heads
    scaling = float(E) ** 0.5

    # ---- K / V projection: once per batch element (first query tile) ----------
    @pl.when(pl.program_id(1) == 0)
    def _():
        xkv = xkv_ref[0]                                            # (N, E) bf16
        kv = jnp.dot(xkv, wkv_ref[...],
                     preferred_element_type=jnp.float32) + bkv_ref[...]
        k_sc[...] = kv[:, :E].astype(k_sc.dtype)                    # (N, E) bf16
        v_sc[...] = kv[:, E:].astype(v_sc.dtype)                    # (N, E) bf16

    # ---- Q projection for this query tile --------------------------------------
    xq = xq_ref[0]                                                  # (tq, E) bf16
    q = jnp.dot(xq, wq_ref[...],
                preferred_element_type=jnp.float32) + bq_ref[...]
    q = q.astype(jnp.bfloat16)                                      # MXU operand

    # ---- per-head attention; results written into a VMEM slab ------------------
    for h in range(num_heads):                                      # static unroll
        lo, hi = h * dh, (h + 1) * dh
        qh = q[:, lo:hi]                                            # (tq, dh) bf16
        kh = k_sc[:, lo:hi]                                         # (N,  dh) bf16
        vh = v_sc[:, lo:hi]                                         # (N,  dh) bf16
        # energy = q @ k^T, contraction on dh without materializing a transpose
        energy = lax.dot_general(qh, kh, (((1,), (1,)), ((), ())),
                                 preferred_element_type=jnp.float32)  # (tq, N) f32
        m = jnp.max(energy, axis=-1, keepdims=True)
        p = jnp.exp(energy - m)                                     # f32 softmax
        # softmax denominator and the post-softmax /sqrt(E) folded into one
        # EUP reciprocal + one VPU multiply
        inv = pl.reciprocal(jnp.sum(p, axis=-1, keepdims=True) * scaling,
                            approx=True)
        att = (p * inv).astype(jnp.bfloat16)
        slab[:, lo:hi] = jnp.dot(att, vh,
                                 preferred_element_type=jnp.float32)  # (tq, dh)

    # ---- output projection: single (tq, E) @ (E, E) matmul ---------------------
    out = jnp.dot(slab[...].astype(jnp.bfloat16), wp_ref[...],
                  preferred_element_type=jnp.float32) + bp_ref[...]
    o_ref[0] = out.astype(o_ref.dtype)


def prepare_mha_params(w_qkv, b_qkv, w_proj, b_proj, *, num_heads,
                       weight_dtype=jnp.bfloat16):
    """One-time prep (call at module init, NOT per forward):
    permute PyTorch's '(h d qkv)' output layout to '(qkv h d)', transpose to
    (in, out) and cast matmul weights to bf16. Biases stay f32."""
    three_e, E = w_qkv.shape
    dh = E // num_heads
    idx = jnp.arange(3 * E)
    c = idx // E              # 0=q, 1=k, 2=v  (target order)
    rest = idx % E
    h = rest // dh
    d = rest % dh
    perm = h * (dh * 3) + d * 3 + c            # source row in PyTorch layout
    w_p = w_qkv[perm]                          # (3E, E), rows = [q | k | v] head-major
    b_p = b_qkv[perm]
    w_t = jnp.transpose(w_p)                   # (E, 3E)
    wq_t = w_t[:, :E].astype(weight_dtype)     # (E, E)
    wkv_t = w_t[:, E:].astype(weight_dtype)    # (E, 2E) = [K | V]
    bq = b_p[:E].reshape(1, E).astype(jnp.float32)
    bkv = b_p[E:].reshape(1, 2 * E).astype(jnp.float32)
    wp_t = jnp.transpose(w_proj).astype(weight_dtype)   # (E, E)
    bp = b_proj.reshape(1, E).astype(jnp.float32)
    return wq_t, bq, wkv_t, bkv, wp_t, bp


def _pick_q_tile(n):
    for cand in (256, 128):
        if n % cand == 0:
            return cand
    return n


def multi_head_attention(x, params, *, num_heads):
    """x: (B, N, E) (any float dtype); params: output of prepare_mha_params."""
    wq_t, bq, wkv_t, bkv, wp_t, bp = params
    B, N, E = x.shape
    dh = E // num_heads
    tq = _pick_q_tile(N)
    nq = N // tq

    x_p = x.astype(jnp.bfloat16)
    kernel = functools.partial(_mha_kernel, num_heads=num_heads, emb_size=E)

    # Advisory cost estimate for XLA's scheduler.
    flops = 2 * B * N * E * (3 * E + E) + 4 * B * num_heads * N * N * dh
    transcendentals = B * num_heads * N * N
    bytes_accessed = (2 * x_p.size * x_p.dtype.itemsize
                      + wq_t.size * wq_t.dtype.itemsize
                      + wkv_t.size * wkv_t.dtype.itemsize
                      + wp_t.size * wp_t.dtype.itemsize
                      + (bq.size + bkv.size + bp.size) * 4
                      + B * N * E * x.dtype.itemsize)

    # VMEM budget: double-buffered blocks + K/V/slab scratch, with headroom.
    bf16 = 2
    need = (2 * (tq * E + N * E + tq * E) * bf16      # xq, xkv, out blocks
            + 2 * (E * E + 2 * E * E + E * E) * bf16  # weight blocks
            + 2 * 4 * E * 4                           # bias blocks (f32)
            + 2 * N * E * bf16                        # K, V scratch
            + tq * E * 4                              # per-head output slab
            + 4 * tq * N * 4)                         # softmax temporaries
    vmem_limit = int(min(64 * 1024 * 1024, max(32 * 1024 * 1024, 2 * need)))

    return pl.pallas_call(
        kernel,
        out_shape=jax.ShapeDtypeStruct((B, N, E), x.dtype),
        grid_spec=pltpu.PrefetchScalarGridSpec(
            num_scalar_prefetch=0,
            grid=(B, nq),
            in_specs=[
                pl.BlockSpec((1, tq, E), lambda b, q: (b, q, 0)),   # x (query tile)
                pl.BlockSpec((1, N, E), lambda b, q: (b, 0, 0)),    # x (full, for K/V)
                pl.BlockSpec((E, E), lambda b, q: (0, 0)),          # Wq^T
                pl.BlockSpec((1, E), lambda b, q: (0, 0)),          # bq
                pl.BlockSpec((E, 2 * E), lambda b, q: (0, 0)),      # Wkv^T
                pl.BlockSpec((1, 2 * E), lambda b, q: (0, 0)),      # bkv
                pl.BlockSpec((E, E), lambda b, q: (0, 0)),          # Wproj^T
                pl.BlockSpec((1, E), lambda b, q: (0, 0)),          # bproj
            ],
            out_specs=pl.BlockSpec((1, tq, E), lambda b, q: (b, q, 0)),
            scratch_shapes=[
                pltpu.VMEM((N, E), jnp.bfloat16),    # K scratch (per batch)
                pltpu.VMEM((N, E), jnp.bfloat16),    # V scratch (per batch)
                pltpu.VMEM((tq, E), jnp.float32),    # per-head output slab
            ],
        ),
        compiler_params=pltpu.CompilerParams(
            dimension_semantics=("parallel", "arbitrary"),
            vmem_limit_bytes=vmem_limit),
        cost_estimate=pl.CostEstimate(
            flops=int(flops),
            transcendentals=int(transcendentals),
            bytes_accessed=int(bytes_accessed)),
    )(x_p, x_p, wq_t, bq, wkv_t, bkv, wp_t, bp)


def mha_reference(x, w_qkv, b_qkv, w_proj, b_proj, *, num_heads):
    """Pure-JAX (f32) replica of the PyTorch forward, for correctness checking."""
    B, N, E = x.shape
    dh = E // num_heads
    qkv = x @ w_qkv.T + b_qkv                              # (B, N, 3E)
    qkv = qkv.reshape(B, N, num_heads, dh, 3)              # (h d qkv) split
    qkv = jnp.transpose(qkv, (4, 0, 2, 1, 3))              # (3, B, H, N, dh)
    q, k, v = qkv[0], qkv[1], qkv[2]
    energy = jnp.einsum('bhqd,bhkd->bhqk', q, k)
    att = jax.nn.softmax(energy, axis=-1) / (E ** 0.5)
    out = jnp.einsum('bhal,bhlv->bhav', att, v)            # (B, H, N, dh)
    out = jnp.transpose(out, (0, 2, 1, 3)).reshape(B, N, E)
    return out @ w_proj.T + b_proj


# TODO(synk): mask / dropout>0 / discriminator (spectral-norm + cdist) paths are
# not implemented; this is the inference path (mask=None, p=0, discriminator=False).

if __name__ == "__main__":
    B, N, E, H = 2, 8, 32, 4   # small shapes consistent with the module (emb % heads == 0)

    key = jax.random.PRNGKey(0)
    k0, k1, k2, k3, k4 = jax.random.split(key, 5)
    x = jax.random.normal(k0, (B, N, E), dtype=jnp.float32)
    w_qkv = jax.random.normal(k1, (3 * E, E), dtype=jnp.float32) * 0.02
    b_qkv = jax.random.normal(k2, (3 * E,), dtype=jnp.float32) * 0.02
    w_proj = jax.random.normal(k3, (E, E), dtype=jnp.float32) * 0.02
    b_proj = jax.random.normal(k4, (E,), dtype=jnp.float32) * 0.02

    params = prepare_mha_params(w_qkv, b_qkv, w_proj, b_proj, num_heads=H)
    params = jax.tree_util.tree_map(jax.block_until_ready, params)  # init-time prep

    out = multi_head_attention(x, params, num_heads=H)
    out = jax.block_until_ready(out)

    ref = mha_reference(x, w_qkv, b_qkv, w_proj, b_proj, num_heads=H)
    assert out.shape == (B, N, E)
    # bf16 matmul operands + approx reciprocal -> compare with relaxed tolerance.
    assert jnp.allclose(out, ref, atol=2e-3, rtol=2e-2), (
        "Pallas output mismatch vs reference; max abs diff = "
        f"{float(jnp.max(jnp.abs(out - ref)))}")

    print("KERNEL_OK")
</pallas_src>

<mosaic_0001>
module attributes {stable_mosaic.version = 11 : i64} {
  func.func @_mha_kernel(%arg0: i32, %arg1: i32, %arg2: memref<1x8x32xbf16, #tpu.memory_space<vmem>>, %arg3: memref<1x8x32xbf16, #tpu.memory_space<vmem>>, %arg4: memref<32x32xbf16, #tpu.memory_space<vmem>>, %arg5: memref<1x32xf32, #tpu.memory_space<vmem>>, %arg6: memref<32x64xbf16, #tpu.memory_space<vmem>>, %arg7: memref<1x64xf32, #tpu.memory_space<vmem>>, %arg8: memref<32x32xbf16, #tpu.memory_space<vmem>>, %arg9: memref<1x32xf32, #tpu.memory_space<vmem>>, %arg10: memref<1x8x32xf32, #tpu.memory_space<vmem>>, %arg11: memref<8x32xbf16, #tpu.memory_space<vmem>>, %arg12: memref<8x32xbf16, #tpu.memory_space<vmem>>, %arg13: memref<8x32xf32, #tpu.memory_space<vmem>>) attributes {dimension_semantics = [#tpu.dimension_semantics<parallel>, #tpu.dimension_semantics<arbitrary>], iteration_bounds = array<i64: 2, 1>, scalar_prefetch = 0 : i64, scratch_operands = 3 : i64, tpu.core_type = #tpu.core_type<tc>, window_params = [{transform_indices = @transform_0, window_bounds = array<i64: 1, 8, 32>}, {transform_indices = @transform_1, window_bounds = array<i64: 1, 8, 32>}, {pipeline_mode = #tpu.pipeline_mode<synchronous>, transform_indices = @transform_2, window_bounds = array<i64: 32, 32>}, {pipeline_mode = #tpu.pipeline_mode<synchronous>, transform_indices = @transform_3, window_bounds = array<i64: 1, 32>}, {pipeline_mode = #tpu.pipeline_mode<synchronous>, transform_indices = @transform_4, window_bounds = array<i64: 32, 64>}, {pipeline_mode = #tpu.pipeline_mode<synchronous>, transform_indices = @transform_5, window_bounds = array<i64: 1, 64>}, {pipeline_mode = #tpu.pipeline_mode<synchronous>, transform_indices = @transform_6, window_bounds = array<i64: 32, 32>}, {pipeline_mode = #tpu.pipeline_mode<synchronous>, transform_indices = @transform_7, window_bounds = array<i64: 1, 32>}, {transform_indices = @transform_8, window_bounds = array<i64: 1, 8, 32>}]} {
    %c0_i32 = arith.constant 0 : i32
    %0 = arith.cmpi eq, %arg1, %c0_i32 : i32
    %1 = arith.extui %0 : i1 to i32
    %c0_i32_0 = arith.constant 0 : i32
    %2 = arith.cmpi ne, %1, %c0_i32_0 : i32
    scf.if %2 {
      %c0_58 = arith.constant 0 : index
      %c0_59 = arith.constant 0 : index
      %c0_60 = arith.constant 0 : index
      %97 = vector.load %arg3[%c0_58, %c0_59, %c0_60] : memref<1x8x32xbf16, #tpu.memory_space<vmem>>, vector<1x8x32xbf16>
      %98 = vector.shape_cast %97 : vector<1x8x32xbf16> to vector<8x32xbf16>
      %c0_61 = arith.constant 0 : index
      %c0_62 = arith.constant 0 : index
      %99 = vector.load %arg6[%c0_61, %c0_62] : memref<32x64xbf16, #tpu.memory_space<vmem>>, vector<32x64xbf16>
      %cst_63 = arith.constant dense<0.000000e+00> : vector<8x64xf32>
      %100 = tpu.matmul %98, %99, %cst_63 {dimension_numbers = #tpu.dot_dimension_numbers<[1], [0], [0], [1], [0, 0, 1, 1], [], []>} : vector<8x32xbf16>, vector<32x64xbf16>, vector<8x64xf32> -> vector<8x64xf32>
      %c0_64 = arith.constant 0 : index
      %c0_65 = arith.constant 0 : index
      %101 = vector.load %arg7[%c0_64, %c0_65] : memref<1x64xf32, #tpu.memory_space<vmem>>, vector<1x64xf32>
      %102 = vector.broadcast %101 : vector<1x64xf32> to vector<8x64xf32>
      %103 = arith.addf %100, %102 : vector<8x64xf32>
      %104 = vector.extract_strided_slice %103 {offsets = [0, 0], sizes = [8, 32], strides = [1, 1]} : vector<8x64xf32> to vector<8x32xf32>
      %105 = arith.truncf %104 : vector<8x32xf32> to vector<8x32xbf16>
      %c0_66 = arith.constant 0 : index
      %c0_67 = arith.constant 0 : index
      %106 = vector.load %arg11[%c0_66, %c0_67] : memref<8x32xbf16, #tpu.memory_space<vmem>>, vector<8x32xbf16>
      tpu.vector_store %arg11[%c0_66, %c0_67], %105 {strides = array<i32>} : memref<8x32xbf16, #tpu.memory_space<vmem>>, vector<8x32xbf16>,
      %107 = vector.extract_strided_slice %103 {offsets = [0, 32], sizes = [8, 32], strides = [1, 1]} : vector<8x64xf32> to vector<8x32xf32>
      %108 = arith.truncf %107 : vector<8x32xf32> to vector<8x32xbf16>
      %c0_68 = arith.constant 0 : index
      %c0_69 = arith.constant 0 : index
      %109 = vector.load %arg12[%c0_68, %c0_69] : memref<8x32xbf16, #tpu.memory_space<vmem>>, vector<8x32xbf16>
      tpu.vector_store %arg12[%c0_68, %c0_69], %108 {strides = array<i32>} : memref<8x32xbf16, #tpu.memory_space<vmem>>, vector<8x32xbf16>,
    } else {
    }
    %c0 = arith.constant 0 : index
    %c0_1 = arith.constant 0 : index
    %c0_2 = arith.constant 0 : index
    %3 = vector.load %arg2[%c0, %c0_1, %c0_2] : memref<1x8x32xbf16, #tpu.memory_space<vmem>>, vector<1x8x32xbf16>
    %4 = vector.shape_cast %3 : vector<1x8x32xbf16> to vector<8x32xbf16>
    %c0_3 = arith.constant 0 : index
    %c0_4 = arith.constant 0 : index
    %5 = vector.load %arg4[%c0_3, %c0_4] : memref<32x32xbf16, #tpu.memory_space<vmem>>, vector<32x32xbf16>
    %cst = arith.constant dense<0.000000e+00> : vector<8x32xf32>
    %6 = tpu.matmul %4, %5, %cst {dimension_numbers = #tpu.dot_dimension_numbers<[1], [0], [0], [1], [0, 0, 1, 1], [], []>} : vector<8x32xbf16>, vector<32x32xbf16>, vector<8x32xf32> -> vector<8x32xf32>
    %c0_5 = arith.constant 0 : index
    %c0_6 = arith.constant 0 : index
    %7 = vector.load %arg5[%c0_5, %c0_6] : memref<1x32xf32, #tpu.memory_space<vmem>>, vector<1x32xf32>
    %8 = vector.broadcast %7 : vector<1x32xf32> to vector<8x32xf32>
    %9 = arith.addf %6, %8 : vector<8x32xf32>
    %10 = arith.truncf %9 : vector<8x32xf32> to vector<8x32xbf16>
    %11 = vector.extract_strided_slice %10 {offsets = [0, 0], sizes = [8, 8], strides = [1, 1]} : vector<8x32xbf16> to vector<8x8xbf16>
    %c0_7 = arith.constant 0 : index
    %c0_8 = arith.constant 0 : index
    %12 = vector.load %arg11[%c0_7, %c0_8] : memref<8x32xbf16, #tpu.memory_space<vmem>>, vector<8x8xbf16>
    %c0_9 = arith.constant 0 : index
    %c0_10 = arith.constant 0 : index
    %13 = vector.load %arg12[%c0_9, %c0_10] : memref<8x32xbf16, #tpu.memory_space<vmem>>, vector<8x8xbf16>
    %cst_11 = arith.constant dense<0.000000e+00> : vector<8x8xf32>
    %14 = tpu.matmul %11, %12, %cst_11 {dimension_numbers = #tpu.dot_dimension_numbers<[1], [1], [0], [0], [0, 0, 1, 0], [], []>} : vector<8x8xbf16>, vector<8x8xbf16>, vector<8x8xf32> -> vector<8x8xf32>
    %cst_12 = arith.constant dense<0xFF800000> : vector<8xf32>
    %15 = vector.multi_reduction <maximumf>, %14, %cst_12 [1] : vector<8x8xf32> to vector<8xf32>
    %16 = vector.shape_cast %15 : vector<8xf32> to vector<8x1xf32>
    %17 = vector.broadcast %16 : vector<8x1xf32> to vector<8x8xf32>
    %18 = arith.subf %14, %17 : vector<8x8xf32>
    %19 = math.exp %18 : vector<8x8xf32>
    %cst_13 = arith.constant dense<0.000000e+00> : vector<8xf32>
    %20 = vector.multi_reduction <add>, %19, %cst_13 [1] : vector<8x8xf32> to vector<8xf32>
    %21 = vector.shape_cast %20 : vector<8xf32> to vector<8x1xf32>
    %cst_14 = arith.constant 5.65685415 : f32
    %22 = vector.broadcast %cst_14 : f32 to vector<8x1xf32>
    %23 = arith.mulf %21, %22 : vector<8x1xf32>
    %24 = tpu.reciprocal %23 {approx = true} : vector<8x1xf32> -> vector<8x1xf32>
    %25 = vector.broadcast %24 : vector<8x1xf32> to vector<8x8xf32>
    %26 = arith.mulf %19, %25 : vector<8x8xf32>
    %27 = arith.truncf %26 : vector<8x8xf32> to vector<8x8xbf16>
    %cst_15 = arith.constant dense<0.000000e+00> : vector<8x8xf32>
    %28 = tpu.matmul %27, %13, %cst_15 {dimension_numbers = #tpu.dot_dimension_numbers<[1], [0], [0], [1], [0, 0, 1, 1], [], []>} : vector<8x8xbf16>, vector<8x8xbf16>, vector<8x8xf32> -> vector<8x8xf32>
    %c0_16 = arith.constant 0 : index
    %c0_17 = arith.constant 0 : index
    %29 = vector.load %arg13[%c0_16, %c0_17] : memref<8x32xf32, #tpu.memory_space<vmem>>, vector<8x8xf32>
    tpu.vector_store %arg13[%c0_16, %c0_17], %28 {strides = array<i32>} : memref<8x32xf32, #tpu.memory_space<vmem>>, vector<8x8xf32>,
    %30 = vector.extract_strided_slice %10 {offsets = [0, 8], sizes = [8, 8], strides = [1, 1]} : vector<8x32xbf16> to vector<8x8xbf16>
    %c0_18 = arith.constant 0 : index
    %c8 = arith.constant 8 : index
    %31 = vector.load %arg11[%c0_18, %c8] : memref<8x32xbf16, #tpu.memory_space<vmem>>, vector<8x8xbf16>
    %c0_19 = arith.constant 0 : index
    %c8_20 = arith.constant 8 : index
    %32 = vector.load %arg12[%c0_19, %c8_20] : memref<8x32xbf16, #tpu.memory_space<vmem>>, vector<8x8xbf16>
    %cst_21 = arith.constant dense<0.000000e+00> : vector<8x8xf32>
    %33 = tpu.matmul %30, %31, %cst_21 {dimension_numbers = #tpu.dot_dimension_numbers<[1], [1], [0], [0], [0, 0, 1, 0], [], []>} : vector<8x8xbf16>, vector<8x8xbf16>, vector<8x8xf32> -> vector<8x8xf32>
    %cst_22 = arith.constant dense<0xFF800000> : vector<8xf32>
    %34 = vector.multi_reduction <maximumf>, %33, %cst_22 [1] : vector<8x8xf32> to vector<8xf32>
    %35 = vector.shape_cast %34 : vector<8xf32> to vector<8x1xf32>
    %36 = vector.broadcast %35 : vector<8x1xf32> to vector<8x8xf32>
    %37 = arith.subf %33, %36 : vector<8x8xf32>
    %38 = math.exp %37 : vector<8x8xf32>
    %cst_23 = arith.constant dense<0.000000e+00> : vector<8xf32>
    %39 = vector.multi_reduction <add>, %38, %cst_23 [1] : vector<8x8xf32> to vector<8xf32>
    %40 = vector.shape_cast %39 : vector<8xf32> to vector<8x1xf32>
    %cst_24 = arith.constant 5.65685415 : f32
    %41 = vector.broadcast %cst_24 : f32 to vector<8x1xf32>
    %42 = arith.mulf %40, %41 : vector<8x1xf32>
    %43 = tpu.reciprocal %42 {approx = true} : vector<8x1xf32> -> vector<8x1xf32>
    %44 = vector.broadcast %43 : vector<8x1xf32> to vector<8x8xf32>
    %45 = arith.mulf %38, %44 : vector<8x8xf32>
    %46 = arith.truncf %45 : vector<8x8xf32> to vector<8x8xbf16>
    %cst_25 = arith.constant dense<0.000000e+00> : vector<8x8xf32>
    %47 = tpu.matmul %46, %32, %cst_25 {dimension_numbers = #tpu.dot_dimension_numbers<[1], [0], [0], [1], [0, 0, 1, 1], [], []>} : vector<8x8xbf16>, vector<8x8xbf16>, vector<8x8xf32> -> vector<8x8xf32>
    %c0_26 = arith.constant 0 : index
    %c8_27 = arith.constant 8 : index
    %48 = vector.load %arg13[%c0_26, %c8_27] : memref<8x32xf32, #tpu.memory_space<vmem>>, vector<8x8xf32>
    tpu.vector_store %arg13[%c0_26, %c8_27], %47 {strides = array<i32>} : memref<8x32xf32, #tpu.memory_space<vmem>>, vector<8x8xf32>,
    %49 = vector.extract_strided_slice %10 {offsets = [0, 16], sizes = [8, 8], strides = [1, 1]} : vector<8x32xbf16> to vector<8x8xbf16>
    %c0_28 = arith.constant 0 : index
    %c16 = arith.constant 16 : index
    %50 = vector.load %arg11[%c0_28, %c16] : memref<8x32xbf16, #tpu.memory_space<vmem>>, vector<8x8xbf16>
    %c0_29 = arith.constant 0 : index
    %c16_30 = arith.constant 16 : index
    %51 = vector.load %arg12[%c0_29, %c16_30] : memref<8x32xbf16, #tpu.memory_space<vmem>>, vector<8x8xbf16>
    %cst_31 = arith.constant dense<0.000000e+00> : vector<8x8xf32>
    %52 = tpu.matmul %49, %50, %cst_31 {dimension_numbers = #tpu.dot_dimension_numbers<[1], [1], [0], [0], [0, 0, 1, 0], [], []>} : vector<8x8xbf16>, vector<8x8xbf16>, vector<8x8xf32> -> vector<8x8xf32>
    %cst_32 = arith.constant dense<0xFF800000> : vector<8xf32>
    %53 = vector.multi_reduction <maximumf>, %52, %cst_32 [1] : vector<8x8xf32> to vector<8xf32>
    %54 = vector.shape_cast %53 : vector<8xf32> to vector<8x1xf32>
    %55 = vector.broadcast %54 : vector<8x1xf32> to vector<8x8xf32>
    %56 = arith.subf %52, %55 : vector<8x8xf32>
    %57 = math.exp %56 : vector<8x8xf32>
    %cst_33 = arith.constant dense<0.000000e+00> : vector<8xf32>
    %58 = vector.multi_reduction <add>, %57, %cst_33 [1] : vector<8x8xf32> to vector<8xf32>
    %59 = vector.shape_cast %58 : vector<8xf32> to vector<8x1xf32>
    %cst_34 = arith.constant 5.65685415 : f32
    %60 = vector.broadcast %cst_34 : f32 to vector<8x1xf32>
    %61 = arith.mulf %59, %60 : vector<8x1xf32>
    %62 = tpu.reciprocal %61 {approx = true} : vector<8x1xf32> -> vector<8x1xf32>
    %63 = vector.broadcast %62 : vector<8x1xf32> to vector<8x8xf32>
    %64 = arith.mulf %57, %63 : vector<8x8xf32>
    %65 = arith.truncf %64 : vector<8x8xf32> to vector<8x8xbf16>
    %cst_35 = arith.constant dense<0.000000e+00> : vector<8x8xf32>
    %66 = tpu.matmul %65, %51, %cst_35 {dimension_numbers = #tpu.dot_dimension_numbers<[1], [0], [0], [1], [0, 0, 1, 1], [], []>} : vector<8x8xbf16>, vector<8x8xbf16>, vector<8x8xf32> -> vector<8x8xf32>
    %c0_36 = arith.constant 0 : index
    %c16_37 = arith.constant 16 : index
    %67 = vector.load %arg13[%c0_36, %c16_37] : memref<8x32xf32, #tpu.memory_space<vmem>>, vector<8x8xf32>
    tpu.vector_store %arg13[%c0_36, %c16_37], %66 {strides = array<i32>} : memref<8x32xf32, #tpu.memory_space<vmem>>, vector<8x8xf32>,
    %68 = vector.extract_strided_slice %10 {offsets = [0, 24], sizes = [8, 8], strides = [1, 1]} : vector<8x32xbf16> to vector<8x8xbf16>
    %c0_38 = arith.constant 0 : index
    %c24 = arith.constant 24 : index
    %69 = vector.load %arg11[%c0_38, %c24] : memref<8x32xbf16, #tpu.memory_space<vmem>>, vector<8x8xbf16>
    %c0_39 = arith.constant 0 : index
    %c24_40 = arith.constant 24 : index
    %70 = vector.load %arg12[%c0_39, %c24_40] : memref<8x32xbf16, #tpu.memory_space<vmem>>, vector<8x8xbf16>
    %cst_41 = arith.constant dense<0.000000e+00> : vector<8x8xf32>
    %71 = tpu.matmul %68, %69, %cst_41 {dimension_numbers = #tpu.dot_dimension_numbers<[1], [1], [0], [0], [0, 0, 1, 0], [], []>} : vector<8x8xbf16>, vector<8x8xbf16>, vector<8x8xf32> -> vector<8x8xf32>
    %cst_42 = arith.constant dense<0xFF800000> : vector<8xf32>
    %72 = vector.multi_reduction <maximumf>, %71, %cst_42 [1] : vector<8x8xf32> to vector<8xf32>
    %73 = vector.shape_cast %72 : vector<8xf32> to vector<8x1xf32>
    %74 = vector.broadcast %73 : vector<8x1xf32> to vector<8x8xf32>
    %75 = arith.subf %71, %74 : vector<8x8xf32>
    %76 = math.exp %75 : vector<8x8xf32>
    %cst_43 = arith.constant dense<0.000000e+00> : vector<8xf32>
    %77 = vector.multi_reduction <add>, %76, %cst_43 [1] : vector<8x8xf32> to vector<8xf32>
    %78 = vector.shape_cast %77 : vector<8xf32> to vector<8x1xf32>
    %cst_44 = arith.constant 5.65685415 : f32
    %79 = vector.broadcast %cst_44 : f32 to vector<8x1xf32>
    %80 = arith.mulf %78, %79 : vector<8x1xf32>
    %81 = tpu.reciprocal %80 {approx = true} : vector<8x1xf32> -> vector<8x1xf32>
    %82 = vector.broadcast %81 : vector<8x1xf32> to vector<8x8xf32>
    %83 = arith.mulf %76, %82 : vector<8x8xf32>
    %84 = arith.truncf %83 : vector<8x8xf32> to vector<8x8xbf16>
    %cst_45 = arith.constant dense<0.000000e+00> : vector<8x8xf32>
    %85 = tpu.matmul %84, %70, %cst_45 {dimension_numbers = #tpu.dot_dimension_numbers<[1], [0], [0], [1], [0, 0, 1, 1], [], []>} : vector<8x8xbf16>, vector<8x8xbf16>, vector<8x8xf32> -> vector<8x8xf32>
    %c0_46 = arith.constant 0 : index
    %c24_47 = arith.constant 24 : index
    %86 = vector.load %arg13[%c0_46, %c24_47] : memref<8x32xf32, #tpu.memory_space<vmem>>, vector<8x8xf32>
    tpu.vector_store %arg13[%c0_46, %c24_47], %85 {strides = array<i32>} : memref<8x32xf32, #tpu.memory_space<vmem>>, vector<8x8xf32>,
    %c0_48 = arith.constant 0 : index
    %c0_49 = arith.constant 0 : index
    %87 = vector.load %arg13[%c0_48, %c0_49] : memref<8x32xf32, #tpu.memory_space<vmem>>, vector<8x32xf32>
    %88 = arith.truncf %87 : vector<8x32xf32> to vector<8x32xbf16>
    %c0_50 = arith.constant 0 : index
    %c0_51 = arith.constant 0 : index
    %89 = vector.load %arg8[%c0_50, %c0_51] : memref<32x32xbf16, #tpu.memory_space<vmem>>, vector<32x32xbf16>
    %cst_52 = arith.constant dense<0.000000e+00> : vector<8x32xf32>
    %90 = tpu.matmul %88, %89, %cst_52 {dimension_numbers = #tpu.dot_dimension_numbers<[1], [0], [0], [1], [0, 0, 1, 1], [], []>} : vector<8x32xbf16>, vector<32x32xbf16>, vector<8x32xf32> -> vector<8x32xf32>
    %c0_53 = arith.constant 0 : index
    %c0_54 = arith.constant 0 : index
    %91 = vector.load %arg9[%c0_53, %c0_54] : memref<1x32xf32, #tpu.memory_space<vmem>>, vector<1x32xf32>
    %92 = vector.broadcast %91 : vector<1x32xf32> to vector<8x32xf32>
    %93 = arith.addf %90, %92 : vector<8x32xf32>
    %c0_55 = arith.constant 0 : index
    %c0_56 = arith.constant 0 : index
    %c0_57 = arith.constant 0 : index
    %94 = vector.load %arg10[%c0_55, %c0_56, %c0_57] : memref<1x8x32xf32, #tpu.memory_space<vmem>>, vector<1x8x32xf32>
    %95 = vector.shape_cast %94 : vector<1x8x32xf32> to vector<8x32xf32>
    %96 = vector.shape_cast %93 : vector<8x32xf32> to vector<1x8x32xf32>
    tpu.vector_store %arg10[%c0_55, %c0_56, %c0_57], %96 {strides = array<i32>} : memref<1x8x32xf32, #tpu.memory_space<vmem>>, vector<1x8x32xf32>,
    return
  }
  func.func @transform_0(%arg0: i32, %arg1: i32) -> (i32, i32, i32) {
    %c0_i32 = arith.constant 0 : i32
    %c0_i32_0 = arith.constant 0 : i32
    return %arg0, %arg1, %c0_i32 : i32, i32, i32
  }
  func.func @transform_1(%arg0: i32, %arg1: i32) -> (i32, i32, i32) {
    %c0_i32 = arith.constant 0 : i32
    %c0_i32_0 = arith.constant 0 : i32
    %c0_i32_1 = arith.constant 0 : i32
    return %arg0, %c0_i32, %c0_i32_0 : i32, i32, i32
  }
  func.func @transform_2(%arg0: i32, %arg1: i32) -> (i32, i32) {
    %c0_i32 = arith.constant 0 : i32
    %c0_i32_0 = arith.constant 0 : i32
    %c0_i32_1 = arith.constant 0 : i32
    return %c0_i32, %c0_i32_0 : i32, i32
  }
  func.func @transform_3(%arg0: i32, %arg1: i32) -> (i32, i32) {
    %c0_i32 = arith.constant 0 : i32
    %c0_i32_0 = arith.constant 0 : i32
    %c0_i32_1 = arith.constant 0 : i32
    return %c0_i32, %c0_i32_0 : i32, i32
  }
  func.func @transform_4(%arg0: i32, %arg1: i32) -> (i32, i32) {
    %c0_i32 = arith.constant 0 : i32
    %c0_i32_0 = arith.constant 0 : i32
    %c0_i32_1 = arith.constant 0 : i32
    return %c0_i32, %c0_i32_0 : i32, i32
  }
  func.func @transform_5(%arg0: i32, %arg1: i32) -> (i32, i32) {
    %c0_i32 = arith.constant 0 : i32
    %c0_i32_0 = arith.constant 0 : i32
    %c0_i32_1 = arith.constant 0 : i32
    return %c0_i32, %c0_i32_0 : i32, i32
  }
  func.func @transform_6(%arg0: i32, %arg1: i32) -> (i32, i32) {
    %c0_i32 = arith.constant 0 : i32
    %c0_i32_0 = arith.constant 0 : i32
    %c0_i32_1 = arith.constant 0 : i32
    return %c0_i32, %c0_i32_0 : i32, i32
  }
  func.func @transform_7(%arg0: i32, %arg1: i32) -> (i32, i32) {
    %c0_i32 = arith.constant 0 : i32
    %c0_i32_0 = arith.constant 0 : i32
    %c0_i32_1 = arith.constant 0 : i32
    return %c0_i32, %c0_i32_0 : i32, i32
  }
  func.func @transform_8(%arg0: i32, %arg1: i32) -> (i32, i32, i32) {
    %c0_i32 = arith.constant 0 : i32
    %c0_i32_0 = arith.constant 0 : i32
    return %arg0, %arg1, %c0_i32 : i32, i32, i32
  }
}

</mosaic_0001>

<bundles_post_ra>
// kernel: tpu_custom_call.1
= control target key start
LH: loop header
LB: loop body
LE: loop exit
PB: predicated region body
PF: predicated region fallthrough
CT: control target
= control target key end

     0   :  { %s1691_s0 = inlined_call_operand.hbm [shape: bf16[2,8,32], index: 0, kind: input, shape index: {}]   ;;  %s1692_s1 = inlined_call_operand.hbm [shape: bf16[2,8,32], index: 1, kind: input, shape index: {}]   ;;  %s1693_s2 = inlined_call_operand.hbm [shape: bf16[32,32], index: 2, kind: input, shape index: {}]   ;;  %s1694_s3 = inlined_call_operand.vmem [shape: f32[1,32], index: 3, kind: input, shape index: {}]   ;;  %s1695_s4 = inlined_call_operand.hbm [shape: bf16[32,64], index: 4, kind: input, shape index: {}]   ;;  %s1696_s5 = inlined_call_operand.vmem [shape: f32[1,64], index: 5, kind: input, shape index: {}]   ;;  %s1697_s6 = inlined_call_operand.hbm [shape: bf16[32,32], index: 6, kind: input, shape index: {}]   ;;  %s1698_s7 = inlined_call_operand.vmem [shape: f32[1,32], index: 7, kind: input, shape index: {}]   ;;  %s1699_s8 = inlined_call_operand.hbm [shape: f32[2,8,32], index: 8, kind: output, shape index: {}]  }
   0x1   :  { %1705 = sst [smem:[#allocation26_spill]] %s1693_s2 }
   0x2   :  { %1706 = sst [smem:[#allocation27_spill]] %s1695_s4 }
   0x3   :  { %1707 = sst [smem:[#allocation28_spill]] %s1697_s6 }
   0x4   :  { %13 = vsyncpa [#allocation6], 0 }
   0x5   :  { %15 = vsyncpa [#allocation6 + $0x1], 0 }
   0x6   :  { %16 = vsyncpa [#allocation9], 0 }
   0x7   :  { %18 = vsyncpa [#allocation9 + $0x1], 0 }
   0x8   :  { %19 = vsyncpa [#allocation12], 0 }
   0x9   :  { %20 = vsyncpa [#allocation7], 0 }
   0xa   :  { %22 = vsyncpa [#allocation7 + $0x1], 0  ;;  %s1469_s27 = smov 0   ;;  %s1471_s28 = smov 0  }
   0xb   :  { %s1473_s29 = smov 0   ;;  %s1475_s30 = smov 0  }
   0xc   :  { %s1477_s9 = smov 0   ;;  %s1479_s10 = smov 0  }
   0xd LB: > { %1708 = sst [smem:[#allocation20_spill]] %s1390_s27  ;;  %s1500_s11 = sadd.s32 4294967295, %s1410_s10   ;;  %s1410_s10 = sphi %s1479_s10, %s28_s10   ;;  %s1406_s9 = sphi %s1477_s9, %s1728_s9   ;;  %s1402_s30 = sphi %s1475_s30, %s1727_s30   ;;  %s1398_s29 = sphi %s1473_s29, %s1726_s29   ;;  %s1394_s28 = sphi %s1471_s28, %s1730_s28   ;;  %s1390_s27 = sphi %s1469_s27, %s1729_s27  }
   0xe   : > { %1709 = sst [smem:[#allocation21_spill]] %s1398_s29  ;;  %p979_p0 = scmp.ge.s32.totalorder %s1410_s10, 1 }
   0xf   : > { %1710 = sst [smem:[#allocation22_spill]] %s1406_s9  ;;  %p63_p1 = scmp.eq.s32.totalorder %s1500_s11, 0 }
  0x10   : > { %p253_p2 = scmp.lt.s32.totalorder %s1410_s10, 3  ;;  %s1711_s2 = sld [smem:[#allocation26_spill]] }
  0x11   : > { %s1412_s16 = smov [#allocation10]   ;;  %p983_p6 = scmp.ge.s32.totalorder %s1410_s10, 2 }
  0x12   : > { %p1508_p3 = pnand %p979_p0, %p253_p2  ;;  %s266_s17 = sshll.u32 %s1412_s16, 4  ;;  %s267_s17 = int_to_ptr.vmem [resolvable:$true] %s266_s17 }
  0x13   : > { %s1714_s4 = sld [smem:[#allocation27_spill]]  ;;  %s1413_s22 = smov 64  }
  0x14   : > { %p1058_p4 = pneg %p1508_p3  ;;  %s1414_s23 = smov 4  }
  0x15   : > { %s1415_s24 = smov [#allocation11]   ;;  %s1715_s6 = sld [smem:[#allocation28_spill]] }
  0x16   : > { %s264_s14 = sshll.u32 %s1711_s2, 4  ;;  %p1516_p5 = pnand %p1058_p4, %p63_p1  ;;  %s265_s14 = int_to_ptr.hbm [resolvable:$true] %s264_s14 }
  0x17   : > { %s283_s25 = sshll.u32 %s1415_s24, 4  ;;  %s1416_s16 = smov [#allocation13]   ;;  %s284_s25 = int_to_ptr.vmem [resolvable:$true] %s283_s25 }
  0x18   : > { %1061 = dma.hbm_to_vmem [thread:$0]  (!%p1516_p5), %s265_s14, 256, %s267_s17, [#allocation9], %s1413_s22, %s1413_s22, %s1414_s23  }
  0x19   : > { %s281_s21 = sshll.u32 %s1714_s4, 4  ;;  %s300_s19 = sshll.u32 %s1416_s16, 4  ;;  %s282_s21 = int_to_ptr.hbm [resolvable:$true] %s281_s21  ;;  %s301_s19 = int_to_ptr.vmem [resolvable:$true] %s300_s19 }
  0x1a   : > { %1064 = dma.hbm_to_vmem [thread:$0]  (!%p1516_p5), %s282_s21, 256, %s284_s25, [#allocation12], %s1413_s22, %s1413_s22, %s1414_s23  }
  0x1b   : > { %s298_s13 = sshll.u32 %s1715_s6, 4  ;;  %s978_s14 = sadd.s32 4294967294, %s1410_s10   ;;  %s299_s13 = int_to_ptr.hbm [resolvable:$true] %s298_s13 }
  0x1c   : > { %1067 = dma.hbm_to_vmem [thread:$0]  (!%p1516_p5), %s299_s13, 256, %s301_s19, [#allocation12], %s1413_s22, %s1413_s22, %s1414_s23  }
  0x1d   : > { %s40_s17 = sadd.s32 1, %s1406_s9  ;;  %s49_s20 = sadd.s32 1, %s1398_s29 }
  0x1e   : > { %p42_p7 = scmp.ge.s32.totalorder %s40_s17, 2  ;;  %p56_p8 = scmp.ne.s32.totalorder %s1398_s29, %s1394_s28 }
  0x1f   : > { %p57_p9 = scmp.eq.s32.totalorder %s1410_s10, 0  ;;  %p62_p10 = scmp.ne.s32.totalorder %s1394_s28, %s1390_s27 }
  0x20   : > { %s1732_s17 = smov (%p42_p7, %s40_s17), 0  ;;  %p240_p13 = scmp.eq.s32.totalorder %s1500_s11, 1 }
  0x21   : > { %1716 = sst [smem:[#allocation23_spill]] %s1732_s17  ;;  %p1543_p11 = por %p57_p9, %p56_p8 }
  0x22   : > { %p1549_p12 = por %p63_p1, %p62_p10  ;;  %s44_s22 = ssub.s32 %s1406_s9, %s1732_s17 }
  0x23   : > { %p47_p0 = scmp.eq.s32.totalorder %s44_s22, 0  ;;  %p246_p2 = scmp.eq.s32.totalorder %s978_s14, 1 }
  0x24   : > { %p1556_p4 = por %p240_p13, %p56_p8  ;;  %p1082_p5 = scmp.lt.s32.totalorder %s1410_s10, 2 }
  0x25   : > { %s1562_s24 = scalar_select %p47_p0, %s1398_s29, %s49_s20  }
  0x26   : > { %p1564_p7 = por %p246_p2, %p62_p10  ;;  %s317_s26 = sand.u32 1, %s1398_s29  }
  0x27   : > { %1720 = sst [smem:[#allocation24_spill]] %s1562_s24  ;;  %s984_s12 = sshll.u32 %s317_s26, 2 }
  0x28   : > { %s1721_s25 = scalar_select %p1564_p7, 1, 0 }
  0x29   : > { %s985_s13 = sshll.u32 %s1406_s9, 2  ;;  %s321_s14 = scalar_lea.vmem [#allocation5], %s984_s12 }
  0x2a   : > { %1722 = sst [smem:[#allocation25_spill]] %s1721_s25  ;;  %s326_s22 = scalar_lea.hbm %s1691_s0, %s985_s13 }
  0x2b   : > { %s330_s2 = sshll.u32 %s321_s14, 4  ;;  %s328_s4 = sshll.u32 %s326_s22, 4  ;;  %s331_s2 = int_to_ptr.vmem [resolvable:$true] %s330_s2  ;;  %s329_s4 = int_to_ptr.hbm [resolvable:$true] %s328_s4 }
  0x2c   : > { %p1069_p8 = pnand %p1082_p5, %p1543_p11  ;;  %s345_s17 = scalar_lea.hbm %s1692_s1, %s985_s13 }
  0x2d   : > { %s337_s24 = sand.u32 1, %s1410_s10   ;;  %s318_s25 = scalar_lea.sflag [#allocation6], %s317_s26 }
  0x2e   : > { %1071 = dma.hbm_to_vmem [thread:$0]  (!%p1069_p8), %s329_s4, 64, %s331_s2, %s318_s25  }
  0x2f   : > { %s347_s29 = sshll.u32 %s345_s17, 4  ;;  %s341_s9 = scalar_lea.vmem [#allocation8], %s984_s12  ;;  %s348_s29 = int_to_ptr.hbm [resolvable:$true] %s347_s29 }
  0x30   : > { %s349_s27 = sshll.u32 %s341_s9, 4  ;;  %s338_s16 = scalar_lea.sflag [#allocation9], %s337_s24  ;;  %s350_s27 = int_to_ptr.vmem [resolvable:$true] %s349_s27 }
  0x31   : > { %1074 = dma.hbm_to_vmem [thread:$0]  (!%p1069_p8), %s348_s29, 64, %s350_s27, %s338_s16  }
  0x32   : > { %358 = sbr.rel (%p1508_p3) target bundleno = 1405 (0x57d), region = 52  ;;  %s1582_s21 = sand.u32 (!%p1508_p3), 1, %s1394_s28  }
  0x33   : > { %s989_s6 = sshll.u32 (!%p1508_p3), %s1582_s21, 2  ;;  %s361_s13 = scalar_lea.sflag (!%p1508_p3), [#allocation6], %s1582_s21 }
  0x34   : > { %s364_s26 = scalar_lea.vmem (!%p1508_p3), [#allocation5], %s989_s6 }
  0x37   : > { %1369 = dma.done.wait (%p1549_p12), %s361_s13, 64  }
  0x38   : > { %1371 = vsyncadd (%p1549_p12), %s361_s13, 4294967232  ;;  %s370_s2 = sand.u32 1, %s1500_s11   ;;  %s374_s27 = scalar_lea.vmem [#allocation8], %s989_s6 }
  0x39   : > { %s371_s4 = scalar_lea.sflag [#allocation9], %s370_s2 }
  0x3a   : > { %1373 = dma.done.wait (%p1549_p12), %s371_s4, 64  }
  0x3b   : > { %1375 = vsyncadd (%p1549_p12), %s371_s4, 4294967232 }
  0x3c   : > { %1377 = dma.done.wait (%p63_p1), [#allocation9], 256  }
  0x3d   : > { %1379 = vsyncadd (%p63_p1), [#allocation9], 4294967040 }
  0x3e   : > { %1381 = dma.done.wait (%p63_p1), [#allocation12], 512  }
  0x3f   : > { %1383 = vsyncadd (%p63_p1), [#allocation12], 4294966784  ;;  %v1035_v0 = vld [vmem:[#allocation11 + $0x8] sm:$0xff]  ;;  %v1037_v1 = vld [vmem:[#allocation10 + $0x8] sm:$0xff]  ;;  %vm454_vm0 = vcmask 261120   ;;  %vm472_vm1 = vcmask 257024  }
  0x40   : > { %v1034_v2 = vld [vmem:[#allocation11] sm:$0xff]  ;;  %464 = vmatpush.bf16.msra.mxu0 %v1035_v0  ;;  %510 = vmatpush.bf16.msra.mxu1 %v1037_v1  ;;  %v1036_v3 = vld [vmem:[#allocation10] sm:$0xff]  ;;  %v433_v4 = vld [vmem:[%s374_s27] sm:$0xf]  ;;  %s1417_s17 = smov 96   ;;  %s1418_s18 = smov 120  }
  0x41   : > { %v479_v5 = vld [vmem:[%s364_s26] sm:$0xf]  ;;  %v1147_v6 = vld [vmem:[%s1696_s5] ss:$0 sm:$0xff]  ;;  %vm520_vm2 = vcmask 64512   ;;  %s1419_s24 = smov 112  }
  0x42   : > { %v1148_v7 = vld [vmem:[%s1694_s3] ss:$0 sm:$0xff]  ;;  %s1420_s25 = smov 104   ;;  %vm556_vm3 = vcmask 1043456   ;;  %s1421_s12 = smov 16   ;;  %vm646_vm4 = vcmask 130112  }
  0x43   : > { %s1422_s19 = smov 8   ;;  %s1423_s22 = smov 24   ;;  %vm717_vm5 = vcmask 195712   ;;  %vm788_vm6 = vcmask 261312  }
  0x44   : > { %465 = vmatpush.bf16.msra.mxu0 %v1034_v2  ;;  %511 = vmatpush.bf16.msra.mxu1 %v1036_v3  ;;  %s1031_s14 = sshll.u32 %s1402_s30, 3  ;;  %s994_s20 = sshll.u32 %s1582_s21, 3 }
  0x45   : > { %s841_s13 = scalar_lea.hbm %s1699_s8, %s1031_s14  ;;  %s427_s4 = scalar_lea.vmem [#allocation14], %s994_s20 }
  0x46   : > { %s843_s27 = sshll.u32 %s427_s4, 4  ;;  %s845_s29 = sshll.u32 %s841_s13, 4  ;;  %s844_s27 = int_to_ptr.vmem [resolvable:$true] %s843_s27  ;;  %s846_s29 = int_to_ptr.hbm [resolvable:$true] %s845_s29 }
  0x47   : > { %1003 = vmatmul.msk.bf16.vlgmr.msra.gmra.mxu0 %vm454_vm0, %v433_v4  ;;  %1012 = vmatmul.msk.bf16.vlgmr.msra.gmra.mxu1 %vm454_vm0, %v479_v5  ;;  %s830_s30 = scalar_lea.sflag [#allocation7], %s1582_s21  ;;  %s1330_s9 = sshra.s32 %s846_s29, 4  ;;  %s1331_s9 = int_to_ptr.hbm [resolvable:$true] %s1330_s9 }
  0x48   : > { %s1332_s11 = scalar_lea.hbm %s1331_s9, 8  ;;  %p1337_p10 = scmp.lt.s32.totalorder %s1331_s9, %s1699_s8 }
  0x49   : > { %p1333_p1 = scmp.ne.s32.totalorder %s1331_s9, %s1332_s11 }
  0x4b   : > { %p1334_p3 = pnand %p1333_p1, %p1556_p4 }
  0x4d   : > { %p1335_p9 = pneg %p1334_p3 }
  0xc4   : > { %v467_v8 = vpop.f32.mrf.mxu0  ;;  %v513_v9 = vpop.f32.mrf.mxu1 }
  0xc5   : > { %v468_v10 = vadd.f32 %v1147_v6, %v467_v8  ;;  %v514_v11 = vadd.f32 %v1148_v7, %v513_v9 }
  0xc7   : > { %v471_v12 = vpack.c.bf16 %v468_v10, %v468_v10  ;;  %v517_v13 = vpack.c.bf16 %v514_v11, %v514_v11 }
  0xc9   : > { %473 = vst.msk [vmem:[#allocation2] sm:$0xf] %vm472_vm1, %v471_v12  ;;  %v577_v14 = vunpack.c.l.b16 %v517_v13  ;;  %475 = vrot.lane.b32.xlu1 %v471_v12, %s1417_s17 }
  0xcb   : > { %v578_v15 = vpack.c.b16 %v577_v14, %v577_v14 }
  0xcc   : > { %v469_v16 = vpop.f32.mrf.mxu0  ;;  %v515_v17 = vpop.f32.mrf.mxu1 }
  0xcd   : > { %579 = vrot.lane.b32.xlu2 %v578_v15, %s1418_s18 }
  0xd0   : > { %v518_v18 = vld [vmem:[#allocation2] sm:$0xf] }
  0xd1   : > { %v648_v19 = vld [vmem:[#allocation2] sm:$0xf]  ;;  %v525_v21 = vsel %vm520_vm2, %v518_v18, 0 }
  0xd2   : > { %v574_v20 = vld [vmem:[#allocation2] sm:$0xf]  ;;  %v653_v22 = vunpack.c.l.b16 %v648_v19  ;;  %534 = vmatpush.bf16.xpose.msra.mxu2 %v525_v21 }
  0xd3   : > { %v582_v23 = vunpack.c.l.b16 %v574_v20  ;;  %v719_v46 = vld [vmem:[#allocation2] sm:$0xf] }
  0xd4   : > { %v654_v24 = vpack.c.b16 %v653_v22, %v653_v22  ;;  %v724_v47 = vunpack.c.l.b16 %v719_v46 }
  0xd5   : > { %v583_v25 = vpack.c.b16 %v582_v23, %v582_v23 }
  0xd6   : > { %655 = vrot.lane.b32.xlu2 %v654_v24, %s1419_s24  ;;  %v725_v48 = vpack.c.b16 %v724_v47, %v724_v47 }
  0xd7   : > { %584 = vrot.lane.b32.xlu1 %v583_v25, %s1418_s18 }
  0xd9   : > { %1013 = vmatmul.msk.bf16.vlgmr.msra.gmra.mxu2 %vm520_vm2, %v517_v13 }
  0xde   : > { %721 = vrot.lane.b32.xlu2 %v578_v15, %s1420_s25 }
  0xdf   : > { %650 = vrot.lane.b32.xlu1 %v578_v15, %s1419_s24 }
 0x127   : > { %v580_v26 = vpop.permute.xlu2 %579 }
 0x130   : > { %v656_v27 = vpop.permute.xlu2 %655 }
 0x131   : > { %v661_v28 = vsel %vm520_vm2, %v656_v27, 0 }
 0x132   : > { %670 = vmatpush.bf16.xpose.msrb.mxu1 %v661_v28 }
 0x138   : > { %v722_v56 = vpop.permute.xlu2 %721 }
 0x13b   : > { %v476_v29 = vpop.permute.xlu1 %475 }
 0x13c   : > { %478 = vst.msk [vmem:[#allocation3] sm:$0xf] %vm472_vm1, %v476_v29 }
 0x143   : > { %v519_v30 = vld [vmem:[#allocation3] sm:$0xf] }
 0x144   : > { %v558_v31 = vsel %vm556_vm3, %v519_v30, 0  ;;  %v649_v6 = vld [vmem:[#allocation3] sm:$0xf] }
 0x145   : > { %567 = vmatpush.bf16.msra.mxu3 %v558_v31  ;;  %v690_v7 = vunpack.c.l.b16 %v649_v6  ;;  %v575_v21 = vld [vmem:[#allocation3] sm:$0xf] }
 0x146   : > { %v619_v23 = vunpack.c.l.b16 %v575_v21  ;;  %v720_v29 = vld [vmem:[#allocation3] sm:$0xf] }
 0x147   : > { %v691_v8 = vpack.c.b16 %v690_v7, %v690_v7  ;;  %v761_v30 = vunpack.c.l.b16 %v720_v29 }
 0x149   : > { %v585_v32 = vpop.permute.xlu1 %584  ;;  %v762_v31 = vpack.c.b16 %v761_v30, %v761_v30 }
 0x14a   : > { %v590_v33 = vsel %vm520_vm2, %v585_v32, 0 }
 0x14b   : > { %599 = vmatpush.bf16.xpose.msrb.mxu3 %v590_v33 }
 0x151   : > { %v651_v34 = vpop.permute.xlu1 %650 }
 0x152   : > { %1017 = vmatmul.msk.bf16.vlgmr.msrb.gmra.mxu1 %vm520_vm2, %v651_v34 }
 0x15c   : > { %v536_v35 = vpop.f32.mrf.mxu2 }
 0x15d   : > { %v540_v36 = vsel %vm520_vm2, %v536_v35, -inf }
 0x15e   : > { %541 = vmax.xlane.f32.xlu0 %v540_v36 }
 0x164   : > { %v538_v37 = vpop.f32.mrf.mxu2 }
 0x1cf   : > { %v672_v38 = vpop.f32.mrf.mxu1 }
 0x1d0   : > { %v676_v39 = vsel %vm520_vm2, %v672_v38, -inf }
 0x1d1   : > { %677 = vmax.xlane.f32.xlu2 %v676_v39  ;;  %v542_v40 = vpop.xlane.xlu0 %541 }
 0x1d2   : > { %v543_v41 = vsub.f32 %v536_v35, %v542_v40 }
 0x1d4   : > { %v544_v42 = vmul.f32 1.442695, %v543_v41 }
 0x1d6   : > { %1150 = vpow2.f32 %v544_v42 }
 0x1d7   : > { %v674_v43 = vpop.f32.mrf.mxu1 }
 0x1dc   : > { %v1151_v44 = vpop.eup %1150 }
 0x1dd   : > { %v546_v45 = vsel %vm520_vm2, %v1151_v44, 0.0 }
 0x1de   : > { %547 = vadd.xlane.f32.xlu0 %v546_v45 }
 0x1f2   : > { %726 = vrot.lane.b32.xlu0 %v725_v48, %s1420_s25 }
 0x244   : > { %v678_v58 = vpop.xlane.xlu2 %677 }
 0x245   : > { %v679_v59 = vsub.f32 %v672_v38, %v678_v58 }
 0x247   : > { %v680_v61 = vmul.f32 1.442695, %v679_v59  ;;  %v1149_v59 = vld [vmem:[%s1698_s7] ss:$0 sm:$0xff] }
 0x251   : > { %v548_v49 = vpop.xlane.xlu0 %547 }
 0x252   : > { %v549_v50 = vmul.f32 5.656854, %v548_v49 }
 0x254   : > { %1152 = vrcp.f32 %v549_v50 }
 0x255   : > { %1154 = vpow2.f32 %v680_v61 }
 0x25a   : > { %v1153_v51 = vpop.eup %1152 }
 0x25b   : > { %v551_v52 = vmul.f32 %v1153_v51, %v1151_v44  ;;  %v1155_v0 = vpop.eup %1154 }
 0x25c   : > { %v682_v2 = vsel %vm520_vm2, %v1155_v0, 0.0 }
 0x25d   : > { %v552_v53 = vpack.c.bf16 %v551_v52, %v551_v52 }
 0x25f   : > { %1014 = vmatmul.msk.bf16.vlgmr.msra.gmra.mxu3 %vm520_vm2, %v552_v53  ;;  %v1039_v53 = vld [vmem:[#allocation13 + $0x8] sm:$0xff] }
 0x260   : > { %821 = vmatpush.bf16.msra.mxu1 %v1039_v53 }
 0x264   : > { %v727_v54 = vpop.permute.xlu0 %726 }
 0x265   : > { %v732_v55 = vsel %vm520_vm2, %v727_v54, 0 }
 0x266   : > { %741 = vmatpush.bf16.xpose.msra.mxu3 %v732_v55  ;;  %v1038_v55 = vld [vmem:[#allocation13] sm:$0xff] }
 0x267   : > { %822 = vmatpush.bf16.msra.mxu1 %v1038_v55 }
 0x26f   : > { %1015 = vmatmul.msk.bf16.vlgmr.msrb.gmra.mxu3 %vm520_vm2, %v580_v26  ;;  %v620_v26 = vpack.c.b16 %v619_v23, %v619_v23 }
 0x27f   : > { %1019 = vmatmul.msk.bf16.vlgmr.msra.gmra.mxu3 %vm520_vm2, %v722_v56 }
 0x2e2   : > { %v569_v57 = vpop.f32.mrf.mxu3 }
 0x2e3   : > { %573 = vst.msk [vmem:[#allocation4] sm:$0xff] %vm520_vm2, %v569_v57 }
 0x2ea   : > { %v571_v60 = vpop.f32.mrf.mxu3 }
 0x2f2   : > { %v601_v62 = vpop.f32.mrf.mxu3 }
 0x2f3   : > { %v605_v63 = vsel %vm520_vm2, %v601_v62, -inf }
 0x2f4   : > { %606 = vmax.xlane.f32.xlu1 %v605_v63 }
 0x2fa   : > { %v603_v1 = vpop.f32.mrf.mxu3 }
 0x2fc   : > { %683 = vadd.xlane.f32.xlu1 %v682_v2 }
 0x302   : > { %v743_v3 = vpop.f32.mrf.mxu3 }
 0x303   : > { %v747_v4 = vsel %vm520_vm2, %v743_v3, -inf }
 0x304   : > { %748 = vmax.xlane.f32.xlu0 %v747_v4 }
 0x30a   : > { %v745_v5 = vpop.f32.mrf.mxu3 }
 0x318   : > { %692 = vrot.lane.b32.xlu0 %v691_v8, %s1419_s24 }
 0x367   : > { %v607_v9 = vpop.xlane.xlu1 %606 }
 0x368   : > { %v608_v10 = vsub.f32 %v601_v62, %v607_v9 }
 0x36a   : > { %v609_v11 = vmul.f32 1.442695, %v608_v10 }
 0x36c   : > { %1156 = vpow2.f32 %v609_v11 }
 0x36f   : > { %v684_v16 = vpop.xlane.xlu1 %683 }
 0x370   : > { %v685_v18 = vmul.f32 5.656854, %v684_v16 }
 0x372   : > { %v1157_v12 = vpop.eup %1156 }
 0x373   : > { %v611_v13 = vsel %vm520_vm2, %v1157_v12, 0.0 }
 0x374   : > { %612 = vadd.xlane.f32.xlu2 %v611_v13 }
 0x377   : > { %v749_v14 = vpop.xlane.xlu0 %748 }
 0x378   : > { %v750_v15 = vsub.f32 %v743_v3, %v749_v14 }
 0x37a   : > { %v751_v17 = vmul.f32 1.442695, %v750_v15 }
 0x37c   : > { %1158 = vpow2.f32 %v751_v17 }
 0x37d   : > { %1160 = vrcp.f32 %v685_v18 }
 0x382   : > { %v1159_v19 = vpop.eup %1158 }
 0x383   : > { %v753_v20 = vsel %vm520_vm2, %v1159_v19, 0.0  ;;  %v1161_v22 = vpop.eup %1160 }
 0x384   : > { %754 = vadd.xlane.f32.xlu1 %v753_v20  ;;  %v687_v24 = vmul.f32 %v1161_v22, %v1155_v0 }
 0x386   : > { %v688_v28 = vpack.c.bf16 %v687_v24, %v687_v24 }
 0x38a   : > { %v693_v25 = vpop.permute.xlu0 %692 }
 0x38b   : > { %v698_v27 = vsel %vm556_vm3, %v693_v25, 0 }
 0x38c   : > { %621 = vrot.lane.b32.xlu2 %v620_v26, %s1418_s18  ;;  %707 = vmatpush.bf16.msrb.mxu2 %v698_v27  ;;  %s1336_s18 = scalar_lea.hbm %s1699_s8, 16 }
 0x38d   : > { %p1338_p11 = scmp.lt.s32.totalorder %s1336_s18, %s1332_s11 }
 0x38f   : > { %1018 = vmatmul.msk.bf16.vlgmr.msrb.gmra.mxu2 %vm520_vm2, %v688_v28  ;;  %p1339_p12 = por %p1338_p11, %p1337_p10 }
 0x391   : > { %p1340_p13 = pnand %p1339_p12, %p1335_p9 }
 0x39d   : > { %763 = vrot.lane.b32.xlu1 %v762_v31, %s1420_s25 }
 0x3e7   : > { %v613_v32 = vpop.xlane.xlu2 %612 }
 0x3e8   : > { %v614_v33 = vmul.f32 5.656854, %v613_v32 }
 0x3ea   : > { %1162 = vrcp.f32 %v614_v33 }
 0x3ef   : > { %v622_v34 = vpop.permute.xlu2 %621 }
 0x3f0   : > { %v1163_v35 = vpop.eup %1162  ;;  %v627_v36 = vsel %vm556_vm3, %v622_v34, 0 }
 0x3f1   : > { %636 = vmatpush.bf16.msrb.mxu0 %v627_v36  ;;  %v616_v37 = vmul.f32 %v1163_v35, %v1157_v12 }
 0x3f3   : > { %v617_v38 = vpack.c.bf16 %v616_v37, %v616_v37 }
 0x3f5   : > { %1016 = vmatmul.msk.bf16.vlgmr.msrb.gmra.mxu0 %vm520_vm2, %v617_v38 }
 0x3f7   : > { %v755_v39 = vpop.xlane.xlu1 %754 }
 0x3f8   : > { %v756_v40 = vmul.f32 5.656854, %v755_v39 }
 0x3fa   : > { %1164 = vrcp.f32 %v756_v40 }
 0x400   : > { %v1165_v41 = vpop.eup %1164 }
 0x401   : > { %v758_v42 = vmul.f32 %v1165_v41, %v1159_v19 }
 0x403   : > { %v759_v45 = vpack.c.bf16 %v758_v42, %v758_v42 }
 0x40f   : > { %v764_v43 = vpop.permute.xlu1 %763 }
 0x410   : > { %v769_v44 = vsel %vm556_vm3, %v764_v43, 0 }
 0x411   : > { %778 = vmatpush.bf16.msra.mxu0 %v769_v44 }
 0x412   : > { %v709_v46 = vpop.f32.mrf.mxu2 }
 0x413   : > { %714 = vrot.lane.b32.xlu0 %v709_v46, %s1421_s12 }
 0x414   : > { %1020 = vmatmul.msk.bf16.vlgmr.msra.gmra.mxu0 %vm520_vm2, %v759_v45 }
 0x41a   : > { %v711_v47 = vpop.f32.mrf.mxu2 }
 0x472   : > { %v638_v48 = vpop.f32.mrf.mxu0 }
 0x473   : > { %643 = vrot.lane.b32.xlu2 %v638_v48, %s1422_s19 }
 0x47a   : > { %v640_v49 = vpop.f32.mrf.mxu0 }
 0x485   : > { %v715_v54 = vpop.permute.xlu0 %714 }
 0x491   : > { %v780_v50 = vpop.f32.mrf.mxu0 }
 0x492   : > { %785 = vrot.lane.b32.xlu2 %v780_v50, %s1423_s22 }
 0x499   : > { %v782_v51 = vpop.f32.mrf.mxu0 }
 0x4cd   : > { %v644_v52 = vpop.permute.xlu2 %643 }
 0x4ce   : > { %647 = vst.msk [vmem:[#allocation4] sm:$0xff] %vm646_vm4, %v644_v52 }
 0x4cf   : > { %718 = vst.msk [vmem:[#allocation4] sm:$0xff] %vm717_vm5, %v715_v54 }
 0x4ec   : > { %v786_v56 = vpop.permute.xlu2 %785 }
 0x4ed   : > { %789 = vst.msk [vmem:[#allocation4] sm:$0xff] %vm788_vm6, %v786_v56 }
 0x4f4   : > { %v790_v57 = vld [vmem:[#allocation4] sm:$0xff] }
 0x4f5   : > { %v791_v58 = vpack.c.bf16 %v790_v57, %v790_v57 }
 0x4f7   : > { %1029 = vmatmul.msk.bf16.vlgmr.msra.gmra.mxu1 %vm454_vm0, %v791_v58 }
 0x574   : > { %v824_v60 = vpop.f32.mrf.mxu1 }
 0x575   : > { %v825_v61 = vadd.f32 %v1149_v59, %v824_v60 }
 0x577   : > { %828 = vst.msk [vmem:[%s427_s4] sm:$0xff] %vm454_vm0, %v825_v61 }
 0x578   : > { %1343 = shalt.err (!%p1340_p13)
}
 0x579   : > { %1056 = dma.vmem_to_hbm [thread:$0]  (%p1556_p4), %s844_s27, 128, %s846_s29, %s830_s30  }
 0x57c   : > { %v826_v62 = vpop.f32.mrf.mxu1 }
 0x57d PF: > { %s1723_s21 = sld [smem:[#allocation20_spill]]  ;;  %p1076_p0 = pnand %p983_p6, %p1564_p7 }
 0x57f   : > { %p1077_p2 = pneg %p1076_p0 }
 0x583   : > { %s857_s19 = sand.u32 1, %s1723_s21  }
 0x584   : > { %s858_s22 = scalar_lea.sflag [#allocation7], %s857_s19 }
 0x585   : > { %1385 = dma.done.wait (%p1077_p2), %s858_s22, 128  }
 0x586   : > { %1387 = vsyncadd (%p1077_p2), %s858_s22, 4294967168  ;;  %s28_s10 = sadd.s32 1, %s1410_s10   ;;  %s1725_s14 = sld [smem:[#allocation21_spill]] }
 0x587   : > { %p25_p5 = scmp.ge.s32.totalorder %s28_s10, 4   ;;  %s1726_s29 = sld [smem:[#allocation24_spill]] }
 0x588   : > { %s1727_s30 = sld [smem:[#allocation22_spill]]  ;;  %s1729_s27 = smov %s1394_s28 }
 0x589   : > { %s1728_s9 = sld [smem:[#allocation23_spill]]  ;;  %27 = sbr.rel (!%p25_p5) target bundleno = 13 (0xd), region = 126 }
 0x58c   : > { %s1730_s28 = smov %s1725_s14 }
 0x58e   :  { %864 = vsyncpa [#allocation6], 1 }
 0x58f   :  { %866 = vsyncpa [#allocation6 + $0x1], 1 }
 0x590   :  { %867 = vsyncpa [#allocation9], 1 }
 0x591   :  { %869 = vsyncpa [#allocation9 + $0x1], 1 }
 0x592   :  { %870 = vsyncpa [#allocation12], 1 }
 0x593   :  { %871 = vsyncpa [#allocation7], 1 }
 0x594   :  { %873 = vsyncpa [#allocation7 + $0x1], 1 }

</bundles_post_ra>
